<compile_context>
chip_gen: v7x
topology: tpu7x:2x2x1
jax: 0.10.0
libtpu: 0.0.40
codegen_flags: <defaults>
</compile_context>

<pallas_src>
from functools import partial

import numpy as np
import jax
import jax.numpy as jnp
from jax.experimental import pallas as pl
from jax.experimental.pallas import tpu as pltpu


# ---------------------------------------------------------------------------
# Plain-numpy "parameter" setup (dense equivalents of calc_A_hat / calc_ppr_exact).
# ---------------------------------------------------------------------------
def calc_A_hat(adj_matrix: np.ndarray) -> np.ndarray:
    nnodes = adj_matrix.shape[0]
    A = adj_matrix + np.eye(nnodes, dtype=np.float64)
    D_vec = np.sum(A, axis=1)
    D_vec_invsqrt = 1.0 / np.sqrt(D_vec)
    return (D_vec_invsqrt[:, None] * A) * D_vec_invsqrt[None, :]


def calc_ppr_exact(adj_matrix: np.ndarray, alpha: float) -> np.ndarray:
    nnodes = adj_matrix.shape[0]
    M = calc_A_hat(adj_matrix)
    A_inner = np.eye(nnodes) - (1.0 - alpha) * M
    return alpha * np.linalg.inv(A_inner)


def _round_up(x: int, m: int) -> int:
    return ((x + m - 1) // m) * m


# ---------------------------------------------------------------------------
# Kernel.
# Signature: (scalar-prefetch refs..., in refs..., out refs..., scratch refs...)
#   idx_ref : SMEM (Bp,)    int32   scalar-prefetched row indices
#   mat_hbm : ANY  (N, N)   f32     PPR matrix, stays in HBM
#   pred_ref: VMEM (tk, C)  f32     auto-pipelined reduction chunk of predictions
#   out_ref : VMEM (tb, C)  f32     resident accumulator across the k axis
#   rows_buf: VMEM (tb, Nk) f32     gathered rows mat[idx[b-tile]]
#   sem     : single shared DMA semaphore
# ---------------------------------------------------------------------------
def _ppr_kernel(idx_ref, mat_hbm, pred_ref, out_ref, rows_buf, sem, *, num_k_static):
    b = pl.program_id(0)
    k = pl.program_id(1)
    tb, nk = rows_buf.shape
    n = mat_hbm.shape[0]          # true (unpadded) reduction length
    tk = pred_ref.shape[0]

    @pl.when(k == 0)
    def _gather_and_init():
        # Zero the resident f32 accumulator (the output block itself).
        out_ref[...] = jnp.zeros_like(out_ref)

        # Zero the padded tail of the reduction axis so padded chunks contribute 0.
        if nk > n:  # static
            rows_buf[:, pl.ds(n, nk - n)] = jnp.zeros((tb, nk - n), jnp.float32)

        # Gather the tb requested full rows of mat (HBM -> VMEM), one shared DMA sem.
        copies = []
        for r in range(tb):
            row = jnp.clip(idx_ref[b * tb + r], 0, n - 1)
            cp = pltpu.make_async_copy(
                mat_hbm.at[pl.ds(row, 1), :],            # (1, N) row in HBM
                rows_buf.at[pl.ds(r, 1), pl.ds(0, n)],   # (1, N) slot in VMEM scratch
                sem,
            )
            cp.start()
            copies.append(cp)
        for cp in copies:
            cp.wait()

    # One (tb, tk) @ (tk, C) MXU matmul per k step, accumulated in the f32 output block.
    if num_k_static == 1:
        rows = rows_buf[...]                              # single K step: whole buffer
    else:
        k_off = pl.multiple_of(k * tk, tk)                # tk is a multiple of 128 here
        rows = rows_buf[:, pl.ds(k_off, tk)]
    out_ref[...] += jnp.dot(rows, pred_ref[...], preferred_element_type=jnp.float32)


# ---------------------------------------------------------------------------
# Wrapper.
# ---------------------------------------------------------------------------
def ppr_exact_forward(mat: jax.Array, predictions: jax.Array, idx: jax.Array,
                      *, tb: int | None = None, tk: int | None = None) -> jax.Array:
    N = mat.shape[0]
    C = predictions.shape[1]
    B = idx.shape[0]

    # ---- reduction (K) tiling: single step for small N, 512-wide chunks otherwise ----
    if tk is None:
        tk = N if N <= 2048 else 512
    Nk = _round_up(N, tk)
    num_k = Nk // tk
    assert tk >= 1 and (num_k == 1 or tk % 128 == 0), "multi-step K tile must be 128-aligned"

    # ---- batch tiling (sublane-aligned, VMEM-budget capped for the rows scratch) ----
    if tb is None:
        tb = min(128, _round_up(B, 8))
        cap = max(8, ((12 * (1 << 20)) // (Nk * 4)) // 8 * 8)   # rows_buf <= ~12 MiB
        tb = max(8, min(tb, cap))
    assert tb >= 8 and tb % 8 == 0
    Bp = _round_up(B, tb)
    num_b = Bp // tb

    mat_f32 = mat.astype(jnp.float32)
    pred_f32 = predictions.astype(jnp.float32)
    if Nk != N:                     # zero-pad reduction axis of the (small) predictions only
        pred_f32 = jnp.pad(pred_f32, ((0, Nk - N), (0, 0)))
    idx_i32 = idx.astype(jnp.int32)
    if Bp != B:
        idx_i32 = jnp.pad(idx_i32, (0, Bp - B))   # padded rows clamped in-kernel, sliced off

    kernel = partial(_ppr_kernel, num_k_static=num_k)

    out_pad = pl.pallas_call(
        kernel,
        out_shape=jax.ShapeDtypeStruct((Bp, C), jnp.float32),
        grid_spec=pltpu.PrefetchScalarGridSpec(
            num_scalar_prefetch=1,                      # idx -> SMEM
            grid=(num_b, num_k),                        # batch tiles x reduction chunks
            in_specs=[
                pl.BlockSpec(memory_space=pl.ANY),      # mat stays in HBM (manual row DMA)
                pl.BlockSpec((tk, C), lambda b, k, idx_ref: (k, 0)),   # pipelined pred chunk
            ],
            out_specs=pl.BlockSpec((tb, C), lambda b, k, idx_ref: (b, 0)),
            scratch_shapes=[
                pltpu.VMEM((tb, Nk), jnp.float32),      # gathered rows mat[idx[b-tile]]
                pltpu.SemaphoreType.DMA(()),            # one shared DMA semaphore
            ],
        ),
        compiler_params=pltpu.CompilerParams(
            dimension_semantics=("parallel", "arbitrary"),
            vmem_limit_bytes=32 * 1024 * 1024,          # explicit: >= v5e default, v7x-safe
        ),
    )(idx_i32, mat_f32, pred_f32)

    return out_pad[:B]


# ---------------------------------------------------------------------------
# Demo / correctness check.
# ---------------------------------------------------------------------------
if __name__ == "__main__":
    def build_problem(key, N, C, B, alpha=0.1, p_edge=0.08):
        k_adj, k_pred, k_idx = jax.random.split(key, 3)
        upper = jax.random.bernoulli(k_adj, p_edge, (N, N)).astype(jnp.float32)
        adj = jnp.triu(upper, 1)
        adj = adj + adj.T                                    # symmetric, no self loops
        ppr = jnp.asarray(calc_ppr_exact(np.asarray(adj, np.float64), alpha), jnp.float32)
        pred = jax.random.normal(k_pred, (N, C), dtype=jnp.float32)
        idx = jax.random.randint(k_idx, (B,), 0, N, dtype=jnp.int32)
        return ppr, pred, idx

    key = jax.random.PRNGKey(0)
    k1, k2 = jax.random.split(key)

    # Case 1: small problem, single K step, 2 batch tiles (exercises the parallel axis).
    ppr, pred, idx = build_problem(k1, N=64, C=8, B=16)
    out = jax.block_until_ready(ppr_exact_forward(ppr, pred, idx, tb=8))
    ref = np.asarray(ppr, np.float64)[np.asarray(idx)] @ np.asarray(pred, np.float64)
    np.testing.assert_allclose(np.asarray(out), ref, rtol=1e-4, atol=1e-4)

    # Case 2: K-tiled problem (grid (2, 2)): pipelined prediction chunks + f32 accumulator.
    ppr, pred, idx = build_problem(k2, N=256, C=8, B=16, p_edge=0.04)
    out = jax.block_until_ready(ppr_exact_forward(ppr, pred, idx, tb=8, tk=128))
    ref = np.asarray(ppr, np.float64)[np.asarray(idx)] @ np.asarray(pred, np.float64)
    np.testing.assert_allclose(np.asarray(out), ref, rtol=1e-4, atol=1e-4)

    print("KERNEL_OK")
</pallas_src>

<mosaic_0001>
module attributes {stable_mosaic.version = 11 : i64} {
  func.func @_ppr_kernel(%arg0: i32, %arg1: i32, %arg2: memref<16xi32, #tpu.memory_space<smem>>, %arg3: memref<64x64xf32, #tpu.memory_space<any>>, %arg4: memref<64x8xf32, #tpu.memory_space<vmem>>, %arg5: memref<8x8xf32, #tpu.memory_space<vmem>>, %arg6: memref<8x64xf32, #tpu.memory_space<vmem>>, %arg7: memref<!tpu.dma_semaphore, #tpu.memory_space<semaphore_mem>>) attributes {dimension_semantics = [#tpu.dimension_semantics<parallel>, #tpu.dimension_semantics<arbitrary>], iteration_bounds = array<i64: 2, 1>, scalar_prefetch = 1 : i64, scratch_operands = 2 : i64, tpu.core_type = #tpu.core_type<tc>, window_params = [{}, {transform_indices = @transform_1, window_bounds = array<i64: 64, 8>}, {transform_indices = @transform_2, window_bounds = array<i64: 8, 8>}]} {
    %c0_i32 = arith.constant 0 : i32
    %0 = arith.cmpi eq, %arg1, %c0_i32 : i32
    %1 = arith.extui %0 : i1 to i32
    %c0_i32_0 = arith.constant 0 : i32
    %2 = arith.cmpi ne, %1, %c0_i32_0 : i32
    scf.if %2 {
      %cst_8 = arith.constant 0.000000e+00 : f32
      %9 = vector.broadcast %cst_8 : f32 to vector<8x8xf32>
      %c0_9 = arith.constant 0 : index
      %c0_10 = arith.constant 0 : index
      %10 = vector.load %arg5[%c0_9, %c0_10] : memref<8x8xf32, #tpu.memory_space<vmem>>, vector<8x8xf32>
      tpu.vector_store %arg5[%c0_9, %c0_10], %9 {strides = array<i32>} : memref<8x8xf32, #tpu.memory_space<vmem>>, vector<8x8xf32>,
      %c8_i32 = arith.constant 8 : i32
      %11 = arith.muli %arg0, %c8_i32 : i32
      %c0_i32_11 = arith.constant 0 : i32
      %12 = arith.addi %11, %c0_i32_11 : i32
      %13 = arith.index_cast %12 : i32 to index
      %14 = memref.load %arg2[%13] : memref<16xi32, #tpu.memory_space<smem>>
      %c0_i32_12 = arith.constant 0 : i32
      %c63_i32 = arith.constant 63 : i32
      %15 = arith.maxsi %c0_i32_12, %14 : i32
      %16 = arith.minsi %c63_i32, %15 : i32
      %c0_i32_13 = arith.constant 0 : i32
      %17 = tpu.memref_slice %arg3[%16, %c0_i32_13] : memref<64x64xf32, #tpu.memory_space<any>> -> memref<1x64xf32, #tpu.memory_space<any>>
      %c0_i32_14 = arith.constant 0 : i32
      %c0_i32_15 = arith.constant 0 : i32
      %18 = tpu.memref_slice %arg6[%c0_i32_14, %c0_i32_15] : memref<8x64xf32, #tpu.memory_space<vmem>> -> memref<1x64xf32, #tpu.memory_space<vmem>>
      tpu.enqueue_dma source(%17 : memref<1x64xf32, #tpu.memory_space<any>>) target(%18 : memref<1x64xf32, #tpu.memory_space<vmem>>) target_semaphore(%arg7 : memref<!tpu.dma_semaphore, #tpu.memory_space<semaphore_mem>>)
      %c8_i32_16 = arith.constant 8 : i32
      %19 = arith.muli %arg0, %c8_i32_16 : i32
      %c1_i32 = arith.constant 1 : i32
      %20 = arith.addi %19, %c1_i32 : i32
      %21 = arith.index_cast %20 : i32 to index
      %22 = memref.load %arg2[%21] : memref<16xi32, #tpu.memory_space<smem>>
      %c0_i32_17 = arith.constant 0 : i32
      %c63_i32_18 = arith.constant 63 : i32
      %23 = arith.maxsi %c0_i32_17, %22 : i32
      %24 = arith.minsi %c63_i32_18, %23 : i32
      %c0_i32_19 = arith.constant 0 : i32
      %25 = tpu.memref_slice %arg3[%24, %c0_i32_19] : memref<64x64xf32, #tpu.memory_space<any>> -> memref<1x64xf32, #tpu.memory_space<any>>
      %c1_i32_20 = arith.constant 1 : i32
      %c0_i32_21 = arith.constant 0 : i32
      %26 = tpu.memref_slice %arg6[%c1_i32_20, %c0_i32_21] : memref<8x64xf32, #tpu.memory_space<vmem>> -> memref<1x64xf32, #tpu.memory_space<vmem>>
      tpu.enqueue_dma source(%25 : memref<1x64xf32, #tpu.memory_space<any>>) target(%26 : memref<1x64xf32, #tpu.memory_space<vmem>>) target_semaphore(%arg7 : memref<!tpu.dma_semaphore, #tpu.memory_space<semaphore_mem>>)
      %c8_i32_22 = arith.constant 8 : i32
      %27 = arith.muli %arg0, %c8_i32_22 : i32
      %c2_i32 = arith.constant 2 : i32
      %28 = arith.addi %27, %c2_i32 : i32
      %29 = arith.index_cast %28 : i32 to index
      %30 = memref.load %arg2[%29] : memref<16xi32, #tpu.memory_space<smem>>
      %c0_i32_23 = arith.constant 0 : i32
      %c63_i32_24 = arith.constant 63 : i32
      %31 = arith.maxsi %c0_i32_23, %30 : i32
      %32 = arith.minsi %c63_i32_24, %31 : i32
      %c0_i32_25 = arith.constant 0 : i32
      %33 = tpu.memref_slice %arg3[%32, %c0_i32_25] : memref<64x64xf32, #tpu.memory_space<any>> -> memref<1x64xf32, #tpu.memory_space<any>>
      %c2_i32_26 = arith.constant 2 : i32
      %c0_i32_27 = arith.constant 0 : i32
      %34 = tpu.memref_slice %arg6[%c2_i32_26, %c0_i32_27] : memref<8x64xf32, #tpu.memory_space<vmem>> -> memref<1x64xf32, #tpu.memory_space<vmem>>
      tpu.enqueue_dma source(%33 : memref<1x64xf32, #tpu.memory_space<any>>) target(%34 : memref<1x64xf32, #tpu.memory_space<vmem>>) target_semaphore(%arg7 : memref<!tpu.dma_semaphore, #tpu.memory_space<semaphore_mem>>)
      %c8_i32_28 = arith.constant 8 : i32
      %35 = arith.muli %arg0, %c8_i32_28 : i32
      %c3_i32 = arith.constant 3 : i32
      %36 = arith.addi %35, %c3_i32 : i32
      %37 = arith.index_cast %36 : i32 to index
      %38 = memref.load %arg2[%37] : memref<16xi32, #tpu.memory_space<smem>>
      %c0_i32_29 = arith.constant 0 : i32
      %c63_i32_30 = arith.constant 63 : i32
      %39 = arith.maxsi %c0_i32_29, %38 : i32
      %40 = arith.minsi %c63_i32_30, %39 : i32
      %c0_i32_31 = arith.constant 0 : i32
      %41 = tpu.memref_slice %arg3[%40, %c0_i32_31] : memref<64x64xf32, #tpu.memory_space<any>> -> memref<1x64xf32, #tpu.memory_space<any>>
      %c3_i32_32 = arith.constant 3 : i32
      %c0_i32_33 = arith.constant 0 : i32
      %42 = tpu.memref_slice %arg6[%c3_i32_32, %c0_i32_33] : memref<8x64xf32, #tpu.memory_space<vmem>> -> memref<1x64xf32, #tpu.memory_space<vmem>>
      tpu.enqueue_dma source(%41 : memref<1x64xf32, #tpu.memory_space<any>>) target(%42 : memref<1x64xf32, #tpu.memory_space<vmem>>) target_semaphore(%arg7 : memref<!tpu.dma_semaphore, #tpu.memory_space<semaphore_mem>>)
      %c8_i32_34 = arith.constant 8 : i32
      %43 = arith.muli %arg0, %c8_i32_34 : i32
      %c4_i32 = arith.constant 4 : i32
      %44 = arith.addi %43, %c4_i32 : i32
      %45 = arith.index_cast %44 : i32 to index
      %46 = memref.load %arg2[%45] : memref<16xi32, #tpu.memory_space<smem>>
      %c0_i32_35 = arith.constant 0 : i32
      %c63_i32_36 = arith.constant 63 : i32
      %47 = arith.maxsi %c0_i32_35, %46 : i32
      %48 = arith.minsi %c63_i32_36, %47 : i32
      %c0_i32_37 = arith.constant 0 : i32
      %49 = tpu.memref_slice %arg3[%48, %c0_i32_37] : memref<64x64xf32, #tpu.memory_space<any>> -> memref<1x64xf32, #tpu.memory_space<any>>
      %c4_i32_38 = arith.constant 4 : i32
      %c0_i32_39 = arith.constant 0 : i32
      %50 = tpu.memref_slice %arg6[%c4_i32_38, %c0_i32_39] : memref<8x64xf32, #tpu.memory_space<vmem>> -> memref<1x64xf32, #tpu.memory_space<vmem>>
      tpu.enqueue_dma source(%49 : memref<1x64xf32, #tpu.memory_space<any>>) target(%50 : memref<1x64xf32, #tpu.memory_space<vmem>>) target_semaphore(%arg7 : memref<!tpu.dma_semaphore, #tpu.memory_space<semaphore_mem>>)
      %c8_i32_40 = arith.constant 8 : i32
      %51 = arith.muli %arg0, %c8_i32_40 : i32
      %c5_i32 = arith.constant 5 : i32
      %52 = arith.addi %51, %c5_i32 : i32
      %53 = arith.index_cast %52 : i32 to index
      %54 = memref.load %arg2[%53] : memref<16xi32, #tpu.memory_space<smem>>
      %c0_i32_41 = arith.constant 0 : i32
      %c63_i32_42 = arith.constant 63 : i32
      %55 = arith.maxsi %c0_i32_41, %54 : i32
      %56 = arith.minsi %c63_i32_42, %55 : i32
      %c0_i32_43 = arith.constant 0 : i32
      %57 = tpu.memref_slice %arg3[%56, %c0_i32_43] : memref<64x64xf32, #tpu.memory_space<any>> -> memref<1x64xf32, #tpu.memory_space<any>>
      %c5_i32_44 = arith.constant 5 : i32
      %c0_i32_45 = arith.constant 0 : i32
      %58 = tpu.memref_slice %arg6[%c5_i32_44, %c0_i32_45] : memref<8x64xf32, #tpu.memory_space<vmem>> -> memref<1x64xf32, #tpu.memory_space<vmem>>
      tpu.enqueue_dma source(%57 : memref<1x64xf32, #tpu.memory_space<any>>) target(%58 : memref<1x64xf32, #tpu.memory_space<vmem>>) target_semaphore(%arg7 : memref<!tpu.dma_semaphore, #tpu.memory_space<semaphore_mem>>)
      %c8_i32_46 = arith.constant 8 : i32
      %59 = arith.muli %arg0, %c8_i32_46 : i32
      %c6_i32 = arith.constant 6 : i32
      %60 = arith.addi %59, %c6_i32 : i32
      %61 = arith.index_cast %60 : i32 to index
      %62 = memref.load %arg2[%61] : memref<16xi32, #tpu.memory_space<smem>>
      %c0_i32_47 = arith.constant 0 : i32
      %c63_i32_48 = arith.constant 63 : i32
      %63 = arith.maxsi %c0_i32_47, %62 : i32
      %64 = arith.minsi %c63_i32_48, %63 : i32
      %c0_i32_49 = arith.constant 0 : i32
      %65 = tpu.memref_slice %arg3[%64, %c0_i32_49] : memref<64x64xf32, #tpu.memory_space<any>> -> memref<1x64xf32, #tpu.memory_space<any>>
      %c6_i32_50 = arith.constant 6 : i32
      %c0_i32_51 = arith.constant 0 : i32
      %66 = tpu.memref_slice %arg6[%c6_i32_50, %c0_i32_51] : memref<8x64xf32, #tpu.memory_space<vmem>> -> memref<1x64xf32, #tpu.memory_space<vmem>>
      tpu.enqueue_dma source(%65 : memref<1x64xf32, #tpu.memory_space<any>>) target(%66 : memref<1x64xf32, #tpu.memory_space<vmem>>) target_semaphore(%arg7 : memref<!tpu.dma_semaphore, #tpu.memory_space<semaphore_mem>>)
      %c8_i32_52 = arith.constant 8 : i32
      %67 = arith.muli %arg0, %c8_i32_52 : i32
      %c7_i32 = arith.constant 7 : i32
      %68 = arith.addi %67, %c7_i32 : i32
      %69 = arith.index_cast %68 : i32 to index
      %70 = memref.load %arg2[%69] : memref<16xi32, #tpu.memory_space<smem>>
      %c0_i32_53 = arith.constant 0 : i32
      %c63_i32_54 = arith.constant 63 : i32
      %71 = arith.maxsi %c0_i32_53, %70 : i32
      %72 = arith.minsi %c63_i32_54, %71 : i32
      %c0_i32_55 = arith.constant 0 : i32
      %73 = tpu.memref_slice %arg3[%72, %c0_i32_55] : memref<64x64xf32, #tpu.memory_space<any>> -> memref<1x64xf32, #tpu.memory_space<any>>
      %c7_i32_56 = arith.constant 7 : i32
      %c0_i32_57 = arith.constant 0 : i32
      %74 = tpu.memref_slice %arg6[%c7_i32_56, %c0_i32_57] : memref<8x64xf32, #tpu.memory_space<vmem>> -> memref<1x64xf32, #tpu.memory_space<vmem>>
      tpu.enqueue_dma source(%73 : memref<1x64xf32, #tpu.memory_space<any>>) target(%74 : memref<1x64xf32, #tpu.memory_space<vmem>>) target_semaphore(%arg7 : memref<!tpu.dma_semaphore, #tpu.memory_space<semaphore_mem>>)
      %c0_i32_58 = arith.constant 0 : i32
      %75 = tpu.memref_slice %arg3[%16, %c0_i32_58] : memref<64x64xf32, #tpu.memory_space<any>> -> memref<1x64xf32, #tpu.memory_space<any>>
      %c0_i32_59 = arith.constant 0 : i32
      %c0_i32_60 = arith.constant 0 : i32
      %76 = tpu.memref_slice %arg6[%c0_i32_59, %c0_i32_60] : memref<8x64xf32, #tpu.memory_space<vmem>> -> memref<1x64xf32, #tpu.memory_space<vmem>>
      tpu.wait_dma2 semaphore(%arg7 : memref<!tpu.dma_semaphore, #tpu.memory_space<semaphore_mem>>) src(%75 : memref<1x64xf32, #tpu.memory_space<any>>) dst(%76 : memref<1x64xf32, #tpu.memory_space<vmem>>)
      %c0_i32_61 = arith.constant 0 : i32
      %77 = tpu.memref_slice %arg3[%24, %c0_i32_61] : memref<64x64xf32, #tpu.memory_space<any>> -> memref<1x64xf32, #tpu.memory_space<any>>
      %c1_i32_62 = arith.constant 1 : i32
      %c0_i32_63 = arith.constant 0 : i32
      %78 = tpu.memref_slice %arg6[%c1_i32_62, %c0_i32_63] : memref<8x64xf32, #tpu.memory_space<vmem>> -> memref<1x64xf32, #tpu.memory_space<vmem>>
      tpu.wait_dma2 semaphore(%arg7 : memref<!tpu.dma_semaphore, #tpu.memory_space<semaphore_mem>>) src(%77 : memref<1x64xf32, #tpu.memory_space<any>>) dst(%78 : memref<1x64xf32, #tpu.memory_space<vmem>>)
      %c0_i32_64 = arith.constant 0 : i32
      %79 = tpu.memref_slice %arg3[%32, %c0_i32_64] : memref<64x64xf32, #tpu.memory_space<any>> -> memref<1x64xf32, #tpu.memory_space<any>>
      %c2_i32_65 = arith.constant 2 : i32
      %c0_i32_66 = arith.constant 0 : i32
      %80 = tpu.memref_slice %arg6[%c2_i32_65, %c0_i32_66] : memref<8x64xf32, #tpu.memory_space<vmem>> -> memref<1x64xf32, #tpu.memory_space<vmem>>
      tpu.wait_dma2 semaphore(%arg7 : memref<!tpu.dma_semaphore, #tpu.memory_space<semaphore_mem>>) src(%79 : memref<1x64xf32, #tpu.memory_space<any>>) dst(%80 : memref<1x64xf32, #tpu.memory_space<vmem>>)
      %c0_i32_67 = arith.constant 0 : i32
      %81 = tpu.memref_slice %arg3[%40, %c0_i32_67] : memref<64x64xf32, #tpu.memory_space<any>> -> memref<1x64xf32, #tpu.memory_space<any>>
      %c3_i32_68 = arith.constant 3 : i32
      %c0_i32_69 = arith.constant 0 : i32
      %82 = tpu.memref_slice %arg6[%c3_i32_68, %c0_i32_69] : memref<8x64xf32, #tpu.memory_space<vmem>> -> memref<1x64xf32, #tpu.memory_space<vmem>>
      tpu.wait_dma2 semaphore(%arg7 : memref<!tpu.dma_semaphore, #tpu.memory_space<semaphore_mem>>) src(%81 : memref<1x64xf32, #tpu.memory_space<any>>) dst(%82 : memref<1x64xf32, #tpu.memory_space<vmem>>)
      %c0_i32_70 = arith.constant 0 : i32
      %83 = tpu.memref_slice %arg3[%48, %c0_i32_70] : memref<64x64xf32, #tpu.memory_space<any>> -> memref<1x64xf32, #tpu.memory_space<any>>
      %c4_i32_71 = arith.constant 4 : i32
      %c0_i32_72 = arith.constant 0 : i32
      %84 = tpu.memref_slice %arg6[%c4_i32_71, %c0_i32_72] : memref<8x64xf32, #tpu.memory_space<vmem>> -> memref<1x64xf32, #tpu.memory_space<vmem>>
      tpu.wait_dma2 semaphore(%arg7 : memref<!tpu.dma_semaphore, #tpu.memory_space<semaphore_mem>>) src(%83 : memref<1x64xf32, #tpu.memory_space<any>>) dst(%84 : memref<1x64xf32, #tpu.memory_space<vmem>>)
      %c0_i32_73 = arith.constant 0 : i32
      %85 = tpu.memref_slice %arg3[%56, %c0_i32_73] : memref<64x64xf32, #tpu.memory_space<any>> -> memref<1x64xf32, #tpu.memory_space<any>>
      %c5_i32_74 = arith.constant 5 : i32
      %c0_i32_75 = arith.constant 0 : i32
      %86 = tpu.memref_slice %arg6[%c5_i32_74, %c0_i32_75] : memref<8x64xf32, #tpu.memory_space<vmem>> -> memref<1x64xf32, #tpu.memory_space<vmem>>
      tpu.wait_dma2 semaphore(%arg7 : memref<!tpu.dma_semaphore, #tpu.memory_space<semaphore_mem>>) src(%85 : memref<1x64xf32, #tpu.memory_space<any>>) dst(%86 : memref<1x64xf32, #tpu.memory_space<vmem>>)
      %c0_i32_76 = arith.constant 0 : i32
      %87 = tpu.memref_slice %arg3[%64, %c0_i32_76] : memref<64x64xf32, #tpu.memory_space<any>> -> memref<1x64xf32, #tpu.memory_space<any>>
      %c6_i32_77 = arith.constant 6 : i32
      %c0_i32_78 = arith.constant 0 : i32
      %88 = tpu.memref_slice %arg6[%c6_i32_77, %c0_i32_78] : memref<8x64xf32, #tpu.memory_space<vmem>> -> memref<1x64xf32, #tpu.memory_space<vmem>>
      tpu.wait_dma2 semaphore(%arg7 : memref<!tpu.dma_semaphore, #tpu.memory_space<semaphore_mem>>) src(%87 : memref<1x64xf32, #tpu.memory_space<any>>) dst(%88 : memref<1x64xf32, #tpu.memory_space<vmem>>)
      %c0_i32_79 = arith.constant 0 : i32
      %89 = tpu.memref_slice %arg3[%72, %c0_i32_79] : memref<64x64xf32, #tpu.memory_space<any>> -> memref<1x64xf32, #tpu.memory_space<any>>
      %c7_i32_80 = arith.constant 7 : i32
      %c0_i32_81 = arith.constant 0 : i32
      %90 = tpu.memref_slice %arg6[%c7_i32_80, %c0_i32_81] : memref<8x64xf32, #tpu.memory_space<vmem>> -> memref<1x64xf32, #tpu.memory_space<vmem>>
      tpu.wait_dma2 semaphore(%arg7 : memref<!tpu.dma_semaphore, #tpu.memory_space<semaphore_mem>>) src(%89 : memref<1x64xf32, #tpu.memory_space<any>>) dst(%90 : memref<1x64xf32, #tpu.memory_space<vmem>>)
    } else {
    }
    %c0 = arith.constant 0 : index
    %c0_1 = arith.constant 0 : index
    %3 = vector.load %arg6[%c0, %c0_1] : memref<8x64xf32, #tpu.memory_space<vmem>>, vector<8x64xf32>
    %c0_2 = arith.constant 0 : index
    %c0_3 = arith.constant 0 : index
    %4 = vector.load %arg5[%c0_2, %c0_3] : memref<8x8xf32, #tpu.memory_space<vmem>>, vector<8x8xf32>
    %c0_4 = arith.constant 0 : index
    %c0_5 = arith.constant 0 : index
    %5 = vector.load %arg4[%c0_4, %c0_5] : memref<64x8xf32, #tpu.memory_space<vmem>>, vector<64x8xf32>
    %cst = arith.constant dense<0.000000e+00> : vector<8x8xf32>
    %6 = tpu.matmul %3, %5, %cst {dimension_numbers = #tpu.dot_dimension_numbers<[1], [0], [0], [1], [0, 0, 1, 1], [], []>} : vector<8x64xf32>, vector<64x8xf32>, vector<8x8xf32> -> vector<8x8xf32>
    %7 = arith.addf %4, %6 : vector<8x8xf32>
    %c0_6 = arith.constant 0 : index
    %c0_7 = arith.constant 0 : index
    %8 = vector.load %arg5[%c0_6, %c0_7] : memref<8x8xf32, #tpu.memory_space<vmem>>, vector<8x8xf32>
    tpu.vector_store %arg5[%c0_6, %c0_7], %7 {strides = array<i32>} : memref<8x8xf32, #tpu.memory_space<vmem>>, vector<8x8xf32>,
    return
  }
  func.func @transform_1(%arg0: i32, %arg1: i32, %arg2: memref<16xi32, #tpu.memory_space<smem>>) -> (i32, i32) {
    %c0_i32 = arith.constant 0 : i32
    %c0_i32_0 = arith.constant 0 : i32
    return %arg1, %c0_i32 : i32, i32
  }
  func.func @transform_2(%arg0: i32, %arg1: i32, %arg2: memref<16xi32, #tpu.memory_space<smem>>) -> (i32, i32) {
    %c0_i32 = arith.constant 0 : i32
    %c0_i32_0 = arith.constant 0 : i32
    return %arg0, %c0_i32 : i32, i32
  }
}

</mosaic_0001>

<bundles_post_ra>
// kernel: tpu_custom_call.1
= control target key start
LH: loop header
LB: loop body
LE: loop exit
PB: predicated region body
PF: predicated region fallthrough
CT: control target
= control target key end

     0   :  { %s1127_s0 = inlined_call_operand.vmem [shape: s32[16], index: 0, kind: input, shape index: {}]   ;;  %s1128_s1 = inlined_call_operand.vmem [shape: f32[64,64], index: 1, kind: input, shape index: {}]   ;;  %s1129_s2 = inlined_call_operand.vmem [shape: f32[64,8], index: 2, kind: input, shape index: {}]   ;;  %s1130_s3 = inlined_call_operand.vmem [shape: f32[16,8], index: 3, kind: output, shape index: {}]  }
   0x1   :  { %s8_s14 = sshll.u32 %s1127_s0, 4  ;;  %s9_s14 = int_to_ptr.vmem [resolvable:$true] %s8_s14 }
   0x2   :  { %s963_s15 = scalar_lea.vmem %s9_s14, 16  ;;  %p968_p1 = scmp.lt.s32.totalorder %s9_s14, %s9_s14 }
   0x3   :  { %p964_p0 = scmp.ne.s32.totalorder %s9_s14, %s963_s15  ;;  %p969_p2 = scmp.lt.s32.totalorder %s963_s15, %s963_s15 }
   0x5   :  { %p970_p3 = por %p969_p2, %p968_p1 }
   0x7   :  { %p971_p4 = pnand %p970_p3, %p964_p0 }
   0x9   :  { %974 = shalt.err (!%p971_p4)  }
   0xa   :  { %s1003_s16 = smov [#allocation5]  }
   0xb   :  { %11 = dma.vmem_to_smem %s9_s14, 16, %s1003_s16, [#allocation4] }
   0xc   :  { %987 = dma.done.wait [#allocation4], 16 }
   0xd   :  { %988 = vsyncadd [#allocation4], 4294967280 }
   0xe   :  { %13 = sfence }
   0xf   :  { %s1030_s17 = smov 0   ;;  %s1032_s18 = smov 0  }
  0x10   :  { %s1034_s19 = smov 0  }
  0x11 LB: > { %s31_s0 = sadd.s32 1, %s997_s18  ;;  %p832_p5 = scmp.ge.s32.totalorder %s1001_s19, 1  ;;  %s1001_s19 = sphi %s1034_s19, %s19_s19   ;;  %s997_s18 = sphi %s1032_s18, %s1132_s18   ;;  %s993_s17 = sphi %s1030_s17, %s1131_s17  }
  0x12   : > { %p33_p6 = scmp.ge.s32.totalorder %s31_s0, 2  ;;  %p108_p7 = scmp.lt.s32.totalorder %s1001_s19, 3 }
  0x14   : > { %s1134_s0 = smov (%p33_p6, %s31_s0), 0  ;;  %p109_p8 = pnand %p832_p5, %p108_p7 }
  0x15   : > { %p133_p9 = scmp.lt.s32.totalorder (!%p109_p8), %s993_s17, 1  ;;  %s1048_s20 = sshll.u32 (!%p109_p8), %s993_s17, 3  ;;  %vm141_vm0 = vcmask (!%p109_p8), 64512   ;;  %v1004_v0 = vmov (!%p109_p8), 0.0  }
  0x16   : > { %112 = sbr.rel (%p109_p8) target bundleno = 368 (0x170), region = 24  ;;  %s144_s21 = sld [smem:[#allocation5 + %s1048_s20]] (!%p109_p8) }
  0x1c   : > { %p145_p10 = scmp.gt.s32.totalorder (!%p109_p8), %s144_s21, 0  ;;  %p835_p11 = scmp.lt.s32.totalorder (!%p109_p8), %s144_s21, 63 }
  0x1d   : > { %s1136_s17 = smov (!%p133_p9, %s993_s17), 1 }
  0x1e   : > { %s833_s22 = sshll.u32 %s1136_s17, 3  ;;  %s1138_s21 = smov (!%p145_p10, %s144_s21), 0 }
  0x1f   : > { %s1054_s25 = scalar_lea.vmem %s1130_s3, %s833_s22  ;;  %s1140_s21 = smov (!%p835_p11, %s1138_s21), 63 }
  0x20   : > { %142 = vst.msk [vmem:[%s1054_s25] sm:$0xff] %vm141_vm0, %v1004_v0  ;;  %s149_s28 = scalar_lea.vmem %s1128_s1, %s1140_s21 }
  0x21   : > { %v167_v1 = vld [vmem:[%s149_s28] sm:$0x1] }
  0x22   : > { %168 = vst [vmem:[#allocation2] sm:$0x1] %v167_v1 }
  0x23   : > { %193 = vsyncadd [#allocation3], 16  ;;  %s194_s29 = sadd.s32 1, %s1048_s20 }
  0x24   : > { %s195_s30 = sld [smem:[#allocation5 + %s194_s29]] }
  0x2a   : > { %p196_p12 = scmp.gt.s32.totalorder %s195_s30, 0  ;;  %p840_p13 = scmp.lt.s32.totalorder %s195_s30, 63 }
  0x2c   : > { %s1142_s30 = smov (!%p196_p12, %s195_s30), 0 }
  0x2d   : > { %s1144_s30 = smov (!%p840_p13, %s1142_s30), 63 }
  0x2e   : > { %s200_s6 = scalar_lea.vmem %s1128_s1, %s1144_s30 }
  0x2f   : > { %v219_v2 = vld [vmem:[%s200_s6] sm:$0x1] }
  0x30   : > { %220 = vst [vmem:[#allocation2 + $0x1] sm:$0x1] %v219_v2 }
  0x31   : > { %245 = vsyncadd [#allocation3], 16  ;;  %s246_s7 = sadd.s32 2, %s1048_s20 }
  0x32   : > { %s247_s8 = sld [smem:[#allocation5 + %s246_s7]] }
  0x38   : > { %p248_p0 = scmp.gt.s32.totalorder %s247_s8, 0  ;;  %p845_p1 = scmp.lt.s32.totalorder %s247_s8, 63 }
  0x3a   : > { %s1146_s8 = smov (!%p248_p0, %s247_s8), 0 }
  0x3b   : > { %s1148_s8 = smov (!%p845_p1, %s1146_s8), 63 }
  0x3c   : > { %s252_s11 = scalar_lea.vmem %s1128_s1, %s1148_s8 }
  0x3d   : > { %v271_v3 = vld [vmem:[%s252_s11] sm:$0x1] }
  0x3e   : > { %272 = vst [vmem:[#allocation2 + $0x2] sm:$0x1] %v271_v3 }
  0x3f   : > { %297 = vsyncadd [#allocation3], 16  ;;  %s298_s12 = sadd.s32 3, %s1048_s20 }
  0x40   : > { %s299_s13 = sld [smem:[#allocation5 + %s298_s12]] }
  0x46   : > { %p300_p2 = scmp.gt.s32.totalorder %s299_s13, 0  ;;  %p850_p3 = scmp.lt.s32.totalorder %s299_s13, 63 }
  0x48   : > { %s1150_s13 = smov (!%p300_p2, %s299_s13), 0 }
  0x49   : > { %s1152_s13 = smov (!%p850_p3, %s1150_s13), 63 }
  0x4a   : > { %s304_s16 = scalar_lea.vmem %s1128_s1, %s1152_s13 }
  0x4b   : > { %v323_v4 = vld [vmem:[%s304_s16] sm:$0x1] }
  0x4c   : > { %324 = vst [vmem:[#allocation2 + $0x3] sm:$0x1] %v323_v4 }
  0x4d   : > { %349 = vsyncadd [#allocation3], 16  ;;  %s350_s17 = sadd.s32 4, %s1048_s20 }
  0x4e   : > { %s351_s21 = sld [smem:[#allocation5 + %s350_s17]] }
  0x54   : > { %p352_p4 = scmp.gt.s32.totalorder %s351_s21, 0  ;;  %p855_p5 = scmp.lt.s32.totalorder %s351_s21, 63 }
  0x56   : > { %s1154_s21 = smov (!%p352_p4, %s351_s21), 0 }
  0x57   : > { %s1156_s21 = smov (!%p855_p5, %s1154_s21), 63 }
  0x58   : > { %s356_s24 = scalar_lea.vmem %s1128_s1, %s1156_s21 }
  0x59   : > { %v375_v5 = vld [vmem:[%s356_s24] sm:$0x1] }
  0x5a   : > { %376 = vst [vmem:[#allocation2 + $0x4] sm:$0x1] %v375_v5 }
  0x5b   : > { %401 = vsyncadd [#allocation3], 16  ;;  %s402_s26 = sadd.s32 5, %s1048_s20 }
  0x5c   : > { %s403_s27 = sld [smem:[#allocation5 + %s402_s26]] }
  0x62   : > { %p404_p6 = scmp.gt.s32.totalorder %s403_s27, 0  ;;  %p860_p7 = scmp.lt.s32.totalorder %s403_s27, 63 }
  0x64   : > { %s1158_s27 = smov (!%p404_p6, %s403_s27), 0 }
  0x65   : > { %s1160_s27 = smov (!%p860_p7, %s1158_s27), 63 }
  0x66   : > { %s408_s30 = scalar_lea.vmem %s1128_s1, %s1160_s27 }
  0x67   : > { %v427_v6 = vld [vmem:[%s408_s30] sm:$0x1] }
  0x68   : > { %428 = vst [vmem:[#allocation2 + $0x5] sm:$0x1] %v427_v6 }
  0x69   : > { %453 = vsyncadd [#allocation3], 16  ;;  %s454_s4 = sadd.s32 6, %s1048_s20 }
  0x6a   : > { %s455_s5 = sld [smem:[#allocation5 + %s454_s4]] }
  0x70   : > { %p456_p8 = scmp.gt.s32.totalorder %s455_s5, 0  ;;  %p865_p9 = scmp.lt.s32.totalorder %s455_s5, 63 }
  0x72   : > { %s1162_s5 = smov (!%p456_p8, %s455_s5), 0 }
  0x73   : > { %s1164_s5 = smov (!%p865_p9, %s1162_s5), 63 }
  0x74   : > { %s460_s8 = scalar_lea.vmem %s1128_s1, %s1164_s5 }
  0x75   : > { %v479_v7 = vld [vmem:[%s460_s8] sm:$0x1] }
  0x76   : > { %480 = vst [vmem:[#allocation2 + $0x6] sm:$0x1] %v479_v7 }
  0x77   : > { %505 = vsyncadd [#allocation3], 16  ;;  %s506_s9 = sadd.s32 7, %s1048_s20 }
  0x78   : > { %s507_s10 = sld [smem:[#allocation5 + %s506_s9]] }
  0x7e   : > { %p508_p10 = scmp.gt.s32.totalorder %s507_s10, 0  ;;  %p870_p11 = scmp.lt.s32.totalorder %s507_s10, 63 }
  0x80   : > { %s1166_s10 = smov (!%p508_p10, %s507_s10), 0 }
  0x81   : > { %s1168_s10 = smov (!%p870_p11, %s1166_s10), 63 }
  0x82   : > { %s512_s13 = scalar_lea.vmem %s1128_s1, %s1168_s10 }
  0x83   : > { %v531_v8 = vld [vmem:[%s512_s13] sm:$0x1] }
  0x84   : > { %532 = vst [vmem:[#allocation2 + $0x7] sm:$0x1] %v531_v8 }
  0x85   : > { %557 = vsyncadd [#allocation3], 16 }
  0x86   : > { %989 = dma.done.wait [#allocation3], 128 }
  0x87   : > { %990 = vsyncadd [#allocation3], 4294967168  ;;  %v1005_v9 = vmov 0.0|0.0   ;;  %vm1006_vm1 = vmmov 0   ;;  %v577_v10 = vld [vmem:[%s1129_s2] sm:$0xff]  ;;  %v578_v11 = vld [vmem:[%s1129_s2 + $0x8] sm:$0xff] }
  0x88   : > { %923 = vmatprep.subr.bf16.mxu0 %v1005_v9  ;;  %920 = vmatprep.mubr.msk.f32.mxu0 %vm1006_vm1, %v1004_v0  ;;  %v579_v12 = vld [vmem:[%s1129_s2 + $0x10] sm:$0xff]  ;;  %v924_v13 = vpack.c.bf16 %v578_v11, %v577_v10  ;;  %v580_v14 = vld [vmem:[%s1129_s2 + $0x18] sm:$0xff]  ;;  %v581_v16 = vld [vmem:[%s1129_s2 + $0x20] sm:$0xff]  ;;  %vm585_vm2 = vcmask 523264  }
  0x89   : > { %v927_v15 = vpack.c.bf16 %v580_v14, %v579_v12  ;;  %v582_v17 = vld [vmem:[%s1129_s2 + $0x28] sm:$0xff]  ;;  %v583_v19 = vld [vmem:[%s1129_s2 + $0x30] sm:$0xff]  ;;  %v584_v20 = vld [vmem:[%s1129_s2 + $0x38] sm:$0xff] }
  0x8a   : > { %925 = vmatpush3.bf16.msra.mxu0 %v924_v13  ;;  %v930_v18 = vpack.c.bf16 %v582_v17, %v581_v16  ;;  %v933_v21 = vpack.c.bf16 %v584_v20, %v583_v19  ;;  %v576_v23 = vld [vmem:[%s1054_s25] sm:$0xff] }
  0x8b   : > { %926 = vmatprep.subr.bf16.mxu0 %v1005_v9  ;;  %v575_v22 = vld [vmem:[#allocation2] sm:$0xff] }
  0x8e   : > { %928 = vmatpush3.bf16.msra.mxu0 %v927_v15 }
  0x8f   : > { %929 = vmatprep.subr.bf16.mxu0 %v1005_v9 }
  0x92   : > { %931 = vmatpush3.bf16.msra.mxu0 %v930_v18 }
  0x93   : > { %932 = vmatprep.subr.bf16.mxu0 %v1005_v9 }
  0x96   : > { %934 = vmatpush3.bf16.msra.mxu0 %v933_v21 }
  0x99   : > { %921 = vmatmul.mubr.msk.f32.vlgmr.msra.gmra.mrb[0].mxu0 %vm585_vm2, %v575_v22 }
 0x16c   : > { %v655_v24 = vpop.f32.mrb[0].mxu0 }
 0x16d   : > { %v659_v25 = vadd.f32 %v655_v24, %v576_v23  ;;  %v922_v26 = vpop.f32.mrb[1].mxu0 }
 0x16f   : > { %661 = vst.msk [vmem:[%s1054_s25] sm:$0xff] %vm141_vm0, %v659_v25 }
 0x170 PF: > { %s19_s19 = sadd.s32 1, %s1001_s19   ;;  %s1131_s17 = smov %s997_s18 }
 0x171   : > { %p16_p12 = scmp.ge.s32.totalorder %s19_s19, 4   ;;  %s1132_s18 = smov %s1134_s0 }
 0x173   :  { %18 = sbr.rel (!%p16_p12) target bundleno = 17 (0x11), region = 393 }
 0x17a   :  { %681 = vsyncmov [#allocation3] }
 0x17d   :  { %s682_s6 = vpop.sfrf %681 }
 0x17e   :  { %p878_p13 = scmp.ne.s32.totalorder %s682_s6, 0 }
 0x180   :  { %686 = shalt.err (%p878_p13)  }

</bundles_post_ra>
